<compile_context>
chip_gen: v7x
topology: tpu7x:2x2x1
jax: 0.10.0
libtpu: 0.0.40
codegen_flags: <defaults>
</compile_context>

<pallas_src>
import functools

import jax
import jax.numpy as jnp
from jax.experimental import pallas as pl
from jax.experimental.pallas import tpu as pltpu  # noqa: F401  (TPU backend)

LANE = 128  # TPU lane width; hidden/head dims are padded to this for lane-dense ops


# ---------------------------------------------------------------------------
# Fused Pallas kernel: the entire forward pass in one launch
# ---------------------------------------------------------------------------
def tm_hgnn_kernel(a_ref, p_ref, x_ref,
                   w1_ref, b1_ref, w2_ref, b2_ref, w3_ref, b3_ref,
                   wl_ref, bl_ref, o_ref):
    bf16 = jnp.bfloat16
    f32 = jnp.float32

    def gcn(a_bf16, h_bf16, w_ref, b_ref):
        # feature transform (MXU, bf16 in / f32 acc), then propagate + bias (f32)
        hw = jnp.dot(h_bf16, w_ref[...], preferred_element_type=f32)
        return jnp.dot(a_bf16, hw.astype(bf16), preferred_element_type=f32) + b_ref[...]

    # conv1 (all edges) + ReLU
    h = gcn(a_ref[0], x_ref[...], w1_ref, b1_ref)
    h = jnp.maximum(h, 0.0)
    # conv2 (edges with mask == 1) + ReLU
    h = gcn(a_ref[1], h.astype(bf16), w2_ref, b2_ref)
    h = jnp.maximum(h, 0.0)
    # conv3 (edges with mask == 2), no ReLU
    h = gcn(a_ref[2], h.astype(bf16), w3_ref, b3_ref)

    # global mean pool (P rows pre-normalized) + linear head, dropout = identity (eval)
    pooled = jnp.dot(p_ref[...], h.astype(bf16), preferred_element_type=f32)
    out = jnp.dot(pooled.astype(bf16), wl_ref[...], preferred_element_type=f32) + bl_ref[...]
    o_ref[...] = out.astype(o_ref.dtype)


def fused_tm_hgnn(A, P, x, pp):
    """One pallas_call for the whole forward. Whole arrays fit in VMEM at these
    sizes -> no grid, default full-array BlockSpecs, no pipeline machinery."""
    G = P.shape[0]
    return pl.pallas_call(
        tm_hgnn_kernel,
        out_shape=jax.ShapeDtypeStruct((G, LANE), jnp.float32),
    )(A, P, x,
      pp["w1"], pp["b1"], pp["w2"], pp["b2"], pp["w3"], pp["b3"],
      pp["w_lin"], pp["b_lin"])


# ---------------------------------------------------------------------------
# Plain-JAX glue: batched adjacency build (single scatter) + pooling matrix
# ---------------------------------------------------------------------------
def build_norm_adjs(edge_index, edge_mask, num_nodes):
    """Stacked dense D^-1/2 (A + I) D^-1/2 for the 3 layers, one scatter pass.

    Matches the reference: masked edges are dropped (weight 0 here), explicit
    self-loops are replaced by a single weight-1 self-loop per node, degrees
    recomputed per layer.
    """
    src = edge_index[0]
    dst = edge_index[1]
    not_loop = (src != dst).astype(jnp.float32)
    w = jnp.stack([
        jnp.ones(edge_mask.shape, jnp.float32),          # conv1: all edges
        (edge_mask == 1).astype(jnp.float32),            # conv2: mask == 1
        (edge_mask == 2).astype(jnp.float32),            # conv3: mask == 2
    ], axis=0) * not_loop[None, :]                       # (3, E)

    A = jnp.zeros((3, num_nodes, num_nodes), jnp.float32)
    A = A.at[:, dst, src].add(w)                         # ONE scatter for all layers
    A = A + jnp.eye(num_nodes, dtype=jnp.float32)[None]  # weight-1 self-loops
    deg = A.sum(axis=2)                                  # (3, N) in-degree at dst
    dis = jnp.where(deg > 0, jax.lax.rsqrt(deg), 0.0)
    return dis[:, :, None] * A * dis[:, None, :]         # (3, N, N)


def build_pool_matrix(batch, num_graphs, num_nodes):
    onehot = (batch[None, :] == jnp.arange(num_graphs)[:, None]).astype(jnp.float32)
    counts = jnp.maximum(onehot.sum(axis=1, keepdims=True), 1.0)
    return onehot / counts  # (G, N); rows sum to 1 -> mean pooling


# ---------------------------------------------------------------------------
# Parameters: natural shapes -> lane-dense padded bf16/f32 kernel operands
# ---------------------------------------------------------------------------
def _round_up(n, m):
    return ((n + m - 1) // m) * m


def _pad2d(x, rows, cols):
    return jnp.pad(x, ((0, max(rows - x.shape[0], 0)), (0, max(cols - x.shape[1], 0))))


def init_params(key, num_features, hidden_channels):
    ks = jax.random.split(key, 5)
    scale = 0.1
    return {
        # GCNConv lin weights are [out, in] in PyTorch; stored pre-transposed [in, out].
        "w1": scale * jax.random.normal(ks[0], (num_features, hidden_channels), jnp.float32),
        "b1": jnp.zeros((1, hidden_channels), jnp.float32),
        "w2": scale * jax.random.normal(ks[1], (hidden_channels, hidden_channels), jnp.float32),
        "b2": jnp.zeros((1, hidden_channels), jnp.float32),
        "w3": scale * jax.random.normal(ks[2], (hidden_channels, hidden_channels), jnp.float32),
        "b3": jnp.zeros((1, hidden_channels), jnp.float32),
        # nn.Linear(hidden, 1): weight [1, hidden] -> stored transposed [hidden, 1].
        "w_lin": scale * jax.random.normal(ks[3], (hidden_channels, 1), jnp.float32),
        "b_lin": scale * jax.random.normal(ks[4], (1, 1), jnp.float32),
    }


def prepare_params(params):
    """Pad hidden/head dims to the 128-lane width (zero padding keeps the math
    exact) and cast matmul operands to bf16; biases stay f32."""
    fin = params["w1"].shape[0]
    h = params["w1"].shape[1]
    hp = _round_up(h, LANE)
    bf16, f32 = jnp.bfloat16, jnp.float32
    return {
        "w1": _pad2d(params["w1"], fin, hp).astype(bf16),
        "b1": _pad2d(params["b1"], 1, hp).astype(f32),
        "w2": _pad2d(params["w2"], hp, hp).astype(bf16),
        "b2": _pad2d(params["b2"], 1, hp).astype(f32),
        "w3": _pad2d(params["w3"], hp, hp).astype(bf16),
        "b3": _pad2d(params["b3"], 1, hp).astype(f32),
        "w_lin": _pad2d(params["w_lin"], hp, LANE).astype(bf16),
        "b_lin": _pad2d(params["b_lin"], 1, LANE).astype(f32),
    }


# ---------------------------------------------------------------------------
# Full TM_HGNN forward (inference)
# ---------------------------------------------------------------------------
@functools.partial(jax.jit, static_argnames=("num_graphs",))
def tm_hgnn_forward(prepped_params, x, edge_index, edge_mask, batch, num_graphs):
    N = x.shape[0]
    A = build_norm_adjs(edge_index, edge_mask, N).astype(jnp.bfloat16)   # (3, N, N)
    P = build_pool_matrix(batch, num_graphs, N).astype(jnp.bfloat16)     # (G, N)
    out_pad = fused_tm_hgnn(A, P, x.astype(jnp.bfloat16), prepped_params)  # (G, 128)
    # TODO(synk): training-mode dropout (p=0.3) not implemented; inference identity used.
    return out_pad[:, :1]   # real head output is column 0 of the lane-padded slab


if __name__ == "__main__":
    key = jax.random.PRNGKey(0)
    k_x, k_ei, k_em, k_p = jax.random.split(key, 4)

    num_nodes = 16
    num_features = 8
    hidden_channels = 32
    num_edges = 24
    num_graphs = 2

    x = jax.random.normal(k_x, (num_nodes, num_features), jnp.float32)
    edge_index = jax.random.randint(k_ei, (2, num_edges), 0, num_nodes, jnp.int32)
    edge_mask = jax.random.randint(k_em, (num_edges,), 0, 3, jnp.int32)  # values in {0,1,2}
    batch = jnp.concatenate([
        jnp.zeros(num_nodes // 2, jnp.int32),
        jnp.ones(num_nodes - num_nodes // 2, jnp.int32),
    ])

    params = init_params(k_p, num_features, hidden_channels)
    prepped = prepare_params(params)   # one-time padding / bf16 cast (off the hot path)

    out = tm_hgnn_forward(prepped, x, edge_index, edge_mask, batch, num_graphs)
    out = jax.block_until_ready(out)
    assert out.shape == (num_graphs, 1)
    assert bool(jnp.all(jnp.isfinite(out)))
    print("KERNEL_OK")
</pallas_src>

<mosaic_0001>
module attributes {stable_mosaic.version = 11 : i64} {
  func.func @tm_hgnn_kernel(%arg0: memref<3x16x16xbf16, #tpu.memory_space<vmem>>, %arg1: memref<2x16xbf16, #tpu.memory_space<vmem>>, %arg2: memref<16x8xbf16, #tpu.memory_space<vmem>>, %arg3: memref<8x128xbf16, #tpu.memory_space<vmem>>, %arg4: memref<1x128xf32, #tpu.memory_space<vmem>>, %arg5: memref<128x128xbf16, #tpu.memory_space<vmem>>, %arg6: memref<1x128xf32, #tpu.memory_space<vmem>>, %arg7: memref<128x128xbf16, #tpu.memory_space<vmem>>, %arg8: memref<1x128xf32, #tpu.memory_space<vmem>>, %arg9: memref<128x128xbf16, #tpu.memory_space<vmem>>, %arg10: memref<1x128xf32, #tpu.memory_space<vmem>>, %arg11: memref<2x128xf32, #tpu.memory_space<vmem>>) attributes {dimension_semantics = [], scalar_prefetch = 0 : i64, scratch_operands = 0 : i64, tpu.core_type = #tpu.core_type<tc>} {
    %c0 = arith.constant 0 : index
    %c0_0 = arith.constant 0 : index
    %c0_1 = arith.constant 0 : index
    %0 = vector.load %arg0[%c0, %c0_0, %c0_1] : memref<3x16x16xbf16, #tpu.memory_space<vmem>>, vector<1x16x16xbf16>
    %1 = vector.shape_cast %0 : vector<1x16x16xbf16> to vector<16x16xbf16>
    %c0_2 = arith.constant 0 : index
    %c0_3 = arith.constant 0 : index
    %2 = vector.load %arg2[%c0_2, %c0_3] : memref<16x8xbf16, #tpu.memory_space<vmem>>, vector<16x8xbf16>
    %c0_4 = arith.constant 0 : index
    %c0_5 = arith.constant 0 : index
    %3 = vector.load %arg3[%c0_4, %c0_5] : memref<8x128xbf16, #tpu.memory_space<vmem>>, vector<8x128xbf16>
    %cst = arith.constant dense<0.000000e+00> : vector<16x128xf32>
    %4 = tpu.matmul %2, %3, %cst {dimension_numbers = #tpu.dot_dimension_numbers<[1], [0], [0], [1], [0, 0, 1, 1], [], []>} : vector<16x8xbf16>, vector<8x128xbf16>, vector<16x128xf32> -> vector<16x128xf32>
    %5 = arith.truncf %4 : vector<16x128xf32> to vector<16x128xbf16>
    %cst_6 = arith.constant dense<0.000000e+00> : vector<16x128xf32>
    %6 = tpu.matmul %1, %5, %cst_6 {dimension_numbers = #tpu.dot_dimension_numbers<[1], [0], [0], [1], [0, 0, 1, 1], [], []>} : vector<16x16xbf16>, vector<16x128xbf16>, vector<16x128xf32> -> vector<16x128xf32>
    %c0_7 = arith.constant 0 : index
    %c0_8 = arith.constant 0 : index
    %7 = vector.load %arg4[%c0_7, %c0_8] : memref<1x128xf32, #tpu.memory_space<vmem>>, vector<1x128xf32>
    %8 = vector.broadcast %7 : vector<1x128xf32> to vector<16x128xf32>
    %9 = arith.addf %6, %8 : vector<16x128xf32>
    %cst_9 = arith.constant 0.000000e+00 : f32
    %10 = vector.broadcast %cst_9 : f32 to vector<16x128xf32>
    %11 = arith.maximumf %9, %10 : vector<16x128xf32>
    %c1 = arith.constant 1 : index
    %c0_10 = arith.constant 0 : index
    %c0_11 = arith.constant 0 : index
    %12 = vector.load %arg0[%c1, %c0_10, %c0_11] : memref<3x16x16xbf16, #tpu.memory_space<vmem>>, vector<1x16x16xbf16>
    %13 = vector.shape_cast %12 : vector<1x16x16xbf16> to vector<16x16xbf16>
    %14 = arith.truncf %11 : vector<16x128xf32> to vector<16x128xbf16>
    %c0_12 = arith.constant 0 : index
    %c0_13 = arith.constant 0 : index
    %15 = vector.load %arg5[%c0_12, %c0_13] : memref<128x128xbf16, #tpu.memory_space<vmem>>, vector<128x128xbf16>
    %cst_14 = arith.constant dense<0.000000e+00> : vector<16x128xf32>
    %16 = tpu.matmul %14, %15, %cst_14 {dimension_numbers = #tpu.dot_dimension_numbers<[1], [0], [0], [1], [0, 0, 1, 1], [], []>} : vector<16x128xbf16>, vector<128x128xbf16>, vector<16x128xf32> -> vector<16x128xf32>
    %17 = arith.truncf %16 : vector<16x128xf32> to vector<16x128xbf16>
    %cst_15 = arith.constant dense<0.000000e+00> : vector<16x128xf32>
    %18 = tpu.matmul %13, %17, %cst_15 {dimension_numbers = #tpu.dot_dimension_numbers<[1], [0], [0], [1], [0, 0, 1, 1], [], []>} : vector<16x16xbf16>, vector<16x128xbf16>, vector<16x128xf32> -> vector<16x128xf32>
    %c0_16 = arith.constant 0 : index
    %c0_17 = arith.constant 0 : index
    %19 = vector.load %arg6[%c0_16, %c0_17] : memref<1x128xf32, #tpu.memory_space<vmem>>, vector<1x128xf32>
    %20 = vector.broadcast %19 : vector<1x128xf32> to vector<16x128xf32>
    %21 = arith.addf %18, %20 : vector<16x128xf32>
    %cst_18 = arith.constant 0.000000e+00 : f32
    %22 = vector.broadcast %cst_18 : f32 to vector<16x128xf32>
    %23 = arith.maximumf %21, %22 : vector<16x128xf32>
    %c2 = arith.constant 2 : index
    %c0_19 = arith.constant 0 : index
    %c0_20 = arith.constant 0 : index
    %24 = vector.load %arg0[%c2, %c0_19, %c0_20] : memref<3x16x16xbf16, #tpu.memory_space<vmem>>, vector<1x16x16xbf16>
    %25 = vector.shape_cast %24 : vector<1x16x16xbf16> to vector<16x16xbf16>
    %26 = arith.truncf %23 : vector<16x128xf32> to vector<16x128xbf16>
    %c0_21 = arith.constant 0 : index
    %c0_22 = arith.constant 0 : index
    %27 = vector.load %arg7[%c0_21, %c0_22] : memref<128x128xbf16, #tpu.memory_space<vmem>>, vector<128x128xbf16>
    %cst_23 = arith.constant dense<0.000000e+00> : vector<16x128xf32>
    %28 = tpu.matmul %26, %27, %cst_23 {dimension_numbers = #tpu.dot_dimension_numbers<[1], [0], [0], [1], [0, 0, 1, 1], [], []>} : vector<16x128xbf16>, vector<128x128xbf16>, vector<16x128xf32> -> vector<16x128xf32>
    %29 = arith.truncf %28 : vector<16x128xf32> to vector<16x128xbf16>
    %cst_24 = arith.constant dense<0.000000e+00> : vector<16x128xf32>
    %30 = tpu.matmul %25, %29, %cst_24 {dimension_numbers = #tpu.dot_dimension_numbers<[1], [0], [0], [1], [0, 0, 1, 1], [], []>} : vector<16x16xbf16>, vector<16x128xbf16>, vector<16x128xf32> -> vector<16x128xf32>
    %c0_25 = arith.constant 0 : index
    %c0_26 = arith.constant 0 : index
    %31 = vector.load %arg8[%c0_25, %c0_26] : memref<1x128xf32, #tpu.memory_space<vmem>>, vector<1x128xf32>
    %32 = vector.broadcast %31 : vector<1x128xf32> to vector<16x128xf32>
    %33 = arith.addf %30, %32 : vector<16x128xf32>
    %c0_27 = arith.constant 0 : index
    %c0_28 = arith.constant 0 : index
    %34 = vector.load %arg1[%c0_27, %c0_28] : memref<2x16xbf16, #tpu.memory_space<vmem>>, vector<2x16xbf16>
    %35 = arith.truncf %33 : vector<16x128xf32> to vector<16x128xbf16>
    %cst_29 = arith.constant dense<0.000000e+00> : vector<2x128xf32>
    %36 = tpu.matmul %34, %35, %cst_29 {dimension_numbers = #tpu.dot_dimension_numbers<[1], [0], [0], [1], [0, 0, 1, 1], [], []>} : vector<2x16xbf16>, vector<16x128xbf16>, vector<2x128xf32> -> vector<2x128xf32>
    %37 = arith.truncf %36 : vector<2x128xf32> to vector<2x128xbf16>
    %c0_30 = arith.constant 0 : index
    %c0_31 = arith.constant 0 : index
    %38 = vector.load %arg9[%c0_30, %c0_31] : memref<128x128xbf16, #tpu.memory_space<vmem>>, vector<128x128xbf16>
    %cst_32 = arith.constant dense<0.000000e+00> : vector<2x128xf32>
    %39 = tpu.matmul %37, %38, %cst_32 {dimension_numbers = #tpu.dot_dimension_numbers<[1], [0], [0], [1], [0, 0, 1, 1], [], []>} : vector<2x128xbf16>, vector<128x128xbf16>, vector<2x128xf32> -> vector<2x128xf32>
    %c0_33 = arith.constant 0 : index
    %c0_34 = arith.constant 0 : index
    %40 = vector.load %arg10[%c0_33, %c0_34] : memref<1x128xf32, #tpu.memory_space<vmem>>, vector<1x128xf32>
    %41 = vector.broadcast %40 : vector<1x128xf32> to vector<2x128xf32>
    %42 = arith.addf %39, %41 : vector<2x128xf32>
    %c0_35 = arith.constant 0 : index
    %c0_36 = arith.constant 0 : index
    %43 = vector.load %arg11[%c0_35, %c0_36] : memref<2x128xf32, #tpu.memory_space<vmem>>, vector<2x128xf32>
    tpu.vector_store %arg11[%c0_35, %c0_36], %42 {strides = array<i32>} : memref<2x128xf32, #tpu.memory_space<vmem>>, vector<2x128xf32>,
    return
  }
}

</mosaic_0001>

<bundles_post_ra>
// kernel: tm_hgnn_forward.1
= control target key start
LH: loop header
LB: loop body
LE: loop exit
PB: predicated region body
PF: predicated region fallthrough
CT: control target
= control target key end

     0   :  { %vm53_vm0 = vcmask 1043456   ;;  %v852_v0 = vmov 0.0   ;;  %vm853_vm1 = vmmov 0   ;;  %vm49_vm2 = vcmask 64512   ;;  %s1068_s3 = inlined_call_operand.vmem [shape: bf16[8,128], index: 3, kind: input, shape index: {}]   ;;  %s1069_s2 = inlined_call_operand.vmem [shape: bf16[16,8], index: 2, kind: input, shape index: {}]   ;;  %s1070_s0 = inlined_call_operand.vmem [shape: bf16[3,16,16], index: 0, kind: input, shape index: {}]   ;;  %s1071_s5 = inlined_call_operand.vmem [shape: bf16[128,128], index: 5, kind: input, shape index: {}]   ;;  %s1072_s4 = inlined_call_operand.vmem [shape: f32[1,128], index: 4, kind: input, shape index: {}]   ;;  %s1073_s7 = inlined_call_operand.vmem [shape: bf16[128,128], index: 7, kind: input, shape index: {}]   ;;  %s1074_s6 = inlined_call_operand.vmem [shape: f32[1,128], index: 6, kind: input, shape index: {}]   ;;  %s1075_s9 = inlined_call_operand.vmem [shape: bf16[128,128], index: 9, kind: input, shape index: {}]   ;;  %s1076_s8 = inlined_call_operand.vmem [shape: f32[1,128], index: 8, kind: input, shape index: {}]   ;;  %s1077_s1 = inlined_call_operand.vmem [shape: bf16[2,16], index: 1, kind: input, shape index: {}]   ;;  %s1078_s10 = inlined_call_operand.vmem [shape: f32[1,128], index: 10, kind: input, shape index: {}]   ;;  %s1079_s11 = inlined_call_operand.vmem [shape: f32[2,128], index: 11, kind: output, shape index: {}]  }
   0x1   :  { %732 = vmatprep.subr.bf16.mxu0 %v852_v0  ;;  %v43_v1 = vld [vmem:[%s1068_s3] sm:$0xf]  ;;  %734 = vmatprep.mubr.msk.bf16.mxu0 %vm853_vm1, %v852_v0  ;;  %vm111_vm3 = vcmask 130048   ;;  %v827_v11 = vld [vmem:[%s1071_s5 + $0x8] sm:$0xff]   ;;  %v828_v12 = vld [vmem:[%s1071_s5 + $0x10] sm:$0xff]  }
   0x2   :  { %v55_v2 = vsel %vm53_vm0, %v43_v1, 0  ;;  %v824_v3 = vld [vmem:[%s1069_s2] sm:$0xff]   ;;  %764 = vmatprep.subr.bf16.mxu1 %v852_v0  ;;  %766 = vmatprep.mubr.msk.bf16.mxu1 %vm853_vm1, %v852_v0  ;;  %v829_v13 = vld [vmem:[%s1071_s5 + $0x18] sm:$0xff]   ;;  %v831_v15 = vld [vmem:[%s1071_s5 + $0x28] sm:$0xff]  }
   0x3   :  { %733 = vmatpush3.bf16.msra.mxu0 %v55_v2  ;;  %v825_v9 = vld [vmem:[%s1070_s0] sm:$0xff]   ;;  %v832_v16 = vld [vmem:[%s1071_s5 + $0x30] sm:$0xff]   ;;  %v833_v17 = vld [vmem:[%s1071_s5 + $0x38] sm:$0xff]  }
   0x4   :  { %738 = vmatprep.subr.bf16.mxu0 %v852_v0  ;;  %v826_v10 = vld [vmem:[%s1071_s5] sm:$0xff]   ;;  %v834_v33 = vld [vmem:[%s1070_s0 + $0x8] sm:$0xff]   ;;  %v837_v36 = vld [vmem:[%s1073_s7 + $0x10] sm:$0xff]  }
   0x5   :  { %v830_v14 = vld [vmem:[%s1071_s5 + $0x20] sm:$0xff]   ;;  %v836_v35 = vld [vmem:[%s1073_s7 + $0x8] sm:$0xff]   ;;  %v838_v37 = vld [vmem:[%s1073_s7 + $0x18] sm:$0xff]  }
   0x6   :  { %735 = vmatmul.mubr.msk.bf16.vlgmr.msra.gmra.mrb[0].mxu0 %vm49_vm2, %v824_v3  ;;  %v656_v18 = vld [vmem:[%s1072_s4] ss:$0 sm:$0xff]  ;;  %v840_v39 = vld [vmem:[%s1073_s7 + $0x28] sm:$0xff]   ;;  %v841_v40 = vld [vmem:[%s1073_s7 + $0x30] sm:$0xff]  }
   0x7   :  { %740 = vmatprep.mubr.msk.bf16.mxu0 %vm853_vm1, %v852_v0  ;;  %v835_v34 = vld [vmem:[%s1073_s7] sm:$0xff]   ;;  %v842_v41 = vld [vmem:[%s1073_s7 + $0x38] sm:$0xff]   ;;  %v843_v57 = vld [vmem:[%s1070_s0 + $0x10] sm:$0xff]  }
   0x8   :  { %v839_v38 = vld [vmem:[%s1073_s7 + $0x20] sm:$0xff]   ;;  %v845_v59 = vld [vmem:[%s1075_s9 + $0x8] sm:$0xff]   ;;  %v846_v60 = vld [vmem:[%s1075_s9 + $0x10] sm:$0xff]  }
   0x9   :  { %v669_v42 = vld [vmem:[%s1074_s6] ss:$0 sm:$0xff]  ;;  %v847_v61 = vld [vmem:[%s1075_s9 + $0x18] sm:$0xff]   ;;  %v849_v63 = vld [vmem:[%s1075_s9 + $0x28] sm:$0xff]  }
   0xa   :  { %v844_v58 = vld [vmem:[%s1075_s9] sm:$0xff]   ;;  %v850_v1 = vld [vmem:[%s1075_s9 + $0x30] sm:$0xff]  }
   0xb   :  { %v848_v62 = vld [vmem:[%s1075_s9 + $0x20] sm:$0xff]  }
   0xc   :  { %v682_v2 = vld [vmem:[%s1076_s8] ss:$0 sm:$0xff] }
  0xd9   :  { %v91_v4 = vpop.f32.mrb[0].mxu0 }
  0xda   :  { %v736_v5 = vpop.f32.mrb[1].mxu0 }
  0xdb   :  { %v94_v6 = vpop.f32.mrb[2].mxu0 }
  0xdc   :  { %v98_v7 = vpack.c.bf16 %v94_v6, %v91_v4  ;;  %v737_v8 = vpop.f32.mrb[3].mxu0 }
  0xde   :  { %739 = vmatpush3.bf16.msra.mxu0 %v98_v7 }
  0xdf   :  { %744 = vmatprep.subr.bf16.mxu0 %v852_v0 }
  0xe1   :  { %741 = vmatmul.mubr.msk.bf16.vlgmr.msra.gmra.mrb[4].mxu0 %vm111_vm3, %v825_v9 }
  0xe2   :  { %745 = vmatpush3.bf16.msra.mxu0 %v826_v10  ;;  %760 = vmatprep.mubr.msk.bf16.mxu0 %vm853_vm1, %v852_v0  ;;  %v492_v10 = vld [vmem:[%s1077_s1] sm:$0x1] }
  0xe3   :  { %746 = vmatprep.subr.bf16.mxu0 %v852_v0 }
  0xe6   :  { %747 = vmatpush3.bf16.msra.mxu0 %v827_v11 }
  0xe7   :  { %748 = vmatprep.subr.bf16.mxu0 %v852_v0 }
  0xea   :  { %749 = vmatpush3.bf16.msra.mxu0 %v828_v12 }
  0xeb   :  { %750 = vmatprep.subr.bf16.mxu0 %v852_v0 }
  0xee   :  { %751 = vmatpush3.bf16.msra.mxu0 %v829_v13 }
  0xef   :  { %752 = vmatprep.subr.bf16.mxu0 %v852_v0 }
  0xf2   :  { %753 = vmatpush3.bf16.msra.mxu0 %v830_v14 }
  0xf3   :  { %754 = vmatprep.subr.bf16.mxu0 %v852_v0 }
  0xf6   :  { %755 = vmatpush3.bf16.msra.mxu0 %v831_v15 }
  0xf7   :  { %756 = vmatprep.subr.bf16.mxu0 %v852_v0 }
  0xfa   :  { %757 = vmatpush3.bf16.msra.mxu0 %v832_v16  ;;  %v686_v16 = vld [vmem:[%s1078_s10] ss:$0 sm:$0xff] }
  0xfb   :  { %758 = vmatprep.subr.bf16.mxu0 %v852_v0 }
  0xfe   :  { %759 = vmatpush3.bf16.msra.mxu0 %v833_v17 }
  0xff   :  { %790 = vmatprep.subr.bf16.mxu0 %v852_v0 }
 0x1b4   :  { %v149_v19 = vpop.f32.mrb[4].mxu0 }
 0x1b5   :  { %v150_v20 = vadd.f32 %v656_v18, %v149_v19  ;;  %v742_v21 = vpop.f32.mrb[5].mxu0 }
 0x1b6   :  { %v152_v22 = vpop.f32.mrb[6].mxu0 }
 0x1b7   :  { %v153_v23 = vadd.f32 %v656_v18, %v152_v22  ;;  %v743_v24 = vpop.f32.mrb[7].mxu0  ;;  %v156_v25 = vmax.f32 %v150_v20, 0.0 }
 0x1b9   :  { %v157_v26 = vmax.f32 %v153_v23, 0.0 }
 0x1bb   :  { %v161_v27 = vpack.c.bf16 %v157_v26, %v156_v25 }
 0x1bd   :  { %761 = vmatmul.mubr.bf16.vlgmr.msra.gmra.mrb[8].mxu0 %v161_v27 }
 0x1be   :  { %792 = vmatprep.mubr.msk.bf16.mxu0 %vm853_vm1, %v852_v0 }
 0x290   :  { %v260_v28 = vpop.f32.mrb[8].mxu0 }
 0x291   :  { %v762_v29 = vpop.f32.mrb[9].mxu0 }
 0x292   :  { %v263_v30 = vpop.f32.mrb[10].mxu0 }
 0x293   :  { %v267_v31 = vpack.c.bf16 %v263_v30, %v260_v28  ;;  %v763_v32 = vpop.f32.mrb[11].mxu0 }
 0x295   :  { %765 = vmatpush3.bf16.msra.mxu1 %v267_v31 }
 0x296   :  { %770 = vmatprep.subr.bf16.mxu1 %v852_v0 }
 0x298   :  { %767 = vmatmul.mubr.msk.bf16.vlgmr.msra.gmra.mrb[0].mxu1 %vm111_vm3, %v834_v33 }
 0x299   :  { %771 = vmatpush3.bf16.msra.mxu1 %v835_v34  ;;  %786 = vmatprep.mubr.msk.bf16.mxu1 %vm853_vm1, %v852_v0 }
 0x29a   :  { %772 = vmatprep.subr.bf16.mxu1 %v852_v0 }
 0x29d   :  { %773 = vmatpush3.bf16.msra.mxu1 %v836_v35 }
 0x29e   :  { %774 = vmatprep.subr.bf16.mxu1 %v852_v0 }
 0x2a1   :  { %775 = vmatpush3.bf16.msra.mxu1 %v837_v36 }
 0x2a2   :  { %776 = vmatprep.subr.bf16.mxu1 %v852_v0 }
 0x2a5   :  { %777 = vmatpush3.bf16.msra.mxu1 %v838_v37 }
 0x2a6   :  { %778 = vmatprep.subr.bf16.mxu1 %v852_v0 }
 0x2a9   :  { %779 = vmatpush3.bf16.msra.mxu1 %v839_v38 }
 0x2aa   :  { %780 = vmatprep.subr.bf16.mxu1 %v852_v0 }
 0x2ad   :  { %781 = vmatpush3.bf16.msra.mxu1 %v840_v39 }
 0x2ae   :  { %782 = vmatprep.subr.bf16.mxu1 %v852_v0 }
 0x2b1   :  { %783 = vmatpush3.bf16.msra.mxu1 %v841_v40 }
 0x2b2   :  { %784 = vmatprep.subr.bf16.mxu1 %v852_v0 }
 0x2b5   :  { %785 = vmatpush3.bf16.msra.mxu1 %v842_v41 }
 0x2b6   :  { %802 = vmatprep.subr.bf16.mxu1 %v852_v0 }
 0x36b   :  { %v317_v43 = vpop.f32.mrb[0].mxu1 }
 0x36c   :  { %v318_v44 = vadd.f32 %v669_v42, %v317_v43  ;;  %v768_v45 = vpop.f32.mrb[1].mxu1 }
 0x36d   :  { %v320_v46 = vpop.f32.mrb[2].mxu1 }
 0x36e   :  { %v321_v47 = vadd.f32 %v669_v42, %v320_v46  ;;  %v769_v48 = vpop.f32.mrb[3].mxu1  ;;  %v324_v49 = vmax.f32 %v318_v44, 0.0 }
 0x370   :  { %v325_v50 = vmax.f32 %v321_v47, 0.0 }
 0x372   :  { %v329_v51 = vpack.c.bf16 %v325_v50, %v324_v49 }
 0x374   :  { %787 = vmatmul.mubr.bf16.vlgmr.msra.gmra.mrb[4].mxu1 %v329_v51 }
 0x375   :  { %818 = vmatprep.mubr.msk.bf16.mxu1 %vm853_vm1, %v852_v0  ;;  %803 = vmatpush3.bf16.msra.mxu1 %v844_v58 }
 0x376   :  { %804 = vmatprep.subr.bf16.mxu1 %v852_v0 }
 0x379   :  { %805 = vmatpush3.bf16.msra.mxu1 %v845_v59 }
 0x37a   :  { %806 = vmatprep.subr.bf16.mxu1 %v852_v0 }
 0x37d   :  { %807 = vmatpush3.bf16.msra.mxu1 %v846_v60 }
 0x37e   :  { %808 = vmatprep.subr.bf16.mxu1 %v852_v0 }
 0x381   :  { %809 = vmatpush3.bf16.msra.mxu1 %v847_v61 }
 0x382   :  { %810 = vmatprep.subr.bf16.mxu1 %v852_v0 }
 0x385   :  { %811 = vmatpush3.bf16.msra.mxu1 %v848_v62 }
 0x386   :  { %812 = vmatprep.subr.bf16.mxu1 %v852_v0 }
 0x389   :  { %813 = vmatpush3.bf16.msra.mxu1 %v849_v63 }
 0x38a   :  { %814 = vmatprep.subr.bf16.mxu1 %v852_v0 }
 0x38d   :  { %815 = vmatpush3.bf16.msra.mxu1 %v850_v1 }
 0x38e   :  { %816 = vmatprep.subr.bf16.mxu1 %v852_v0 }
 0x447   :  { %v428_v52 = vpop.f32.mrb[4].mxu1 }
 0x448   :  { %v788_v53 = vpop.f32.mrb[5].mxu1 }
 0x449   :  { %v431_v54 = vpop.f32.mrb[6].mxu1 }
 0x44a   :  { %v435_v55 = vpack.c.bf16 %v431_v54, %v428_v52  ;;  %v789_v56 = vpop.f32.mrb[7].mxu1 }
 0x44c   :  { %791 = vmatpush3.bf16.msra.mxu0 %v435_v55 }
 0x44d   :  { %796 = vmatprep.subr.bf16.mxu0 %v852_v0 }
 0x44f   :  { %793 = vmatmul.mubr.msk.bf16.vlgmr.msra.gmra.mrb[12].mxu0 %vm111_vm3, %v843_v57 }
 0x450   :  { %798 = vmatprep.mubr.msk.bf16.mxu0 %vm853_vm1, %v852_v0  ;;  %v851_v0 = vld [vmem:[%s1075_s9 + $0x38] sm:$0xff]  }
 0x451   :  { %817 = vmatpush3.bf16.msra.mxu1 %v851_v0 }
 0x522   :  { %v485_v3 = vpop.f32.mrb[12].mxu0 }
 0x523   :  { %v794_v4 = vpop.f32.mrb[13].mxu0  ;;  %v486_v6 = vadd.f32 %v682_v2, %v485_v3 }
 0x524   :  { %v488_v5 = vpop.f32.mrb[14].mxu0 }
 0x525   :  { %v489_v7 = vadd.f32 %v682_v2, %v488_v5  ;;  %v795_v8 = vpop.f32.mrb[15].mxu0 }
 0x527   :  { %v493_v9 = vpack.c.bf16 %v489_v7, %v486_v6 }
 0x529   :  { %797 = vmatpush3.bf16.msra.mxu0 %v493_v9 }
 0x52c   :  { %799 = vmatmul.mubr.msk.bf16.vlgmr.msra.gmra.mrb[16].mxu0 %vm111_vm3, %v492_v10 }
 0x5ff   :  { %v531_v11 = vpop.f32.mrb[16].mxu0 }
 0x600   :  { %v537_v12 = vpack.c.bf16 %v531_v11, %v531_v11  ;;  %v800_v13 = vpop.f32.mrb[17].mxu0 }
 0x601   :  { %v534_v14 = vpop.f32.mrb[18].mxu0 }
 0x602   :  { %v801_v15 = vpop.f32.mrb[19].mxu0  ;;  %819 = vmatmul.mubr.bf16.vlgmr.msra.gmra.mrb[8].mxu1 %v537_v12 }
 0x6d5   :  { %v643_v17 = vpop.f32.mrb[8].mxu1 }
 0x6d6   :  { %v644_v18 = vadd.f32 %v686_v16, %v643_v17  ;;  %v820_v19 = vpop.f32.mrb[9].mxu1 }
 0x6d7   :  { %v646_v20 = vpop.f32.mrb[10].mxu1 }
 0x6d8   :  { %649 = vst [vmem:[%s1079_s11] sm:$0x3] %v644_v18  ;;  %v821_v21 = vpop.f32.mrb[11].mxu1 }

</bundles_post_ra>
